<compile_context>
chip_gen: v6e
topology: v6e:2x2x1
jax: 0.10.0
libtpu: 0.0.40
codegen_flags: <defaults>
</compile_context>

<pallas_src>
from functools import partial

import jax
import jax.numpy as jnp
from jax.experimental import pallas as pl
from jax.experimental.pallas import tpu as pltpu


def _round_up(n: int, m: int) -> int:
    return (n + m - 1) // m * m


def _make_conv_kernel(K: int, TT: int):
    """Kernel computing one (C_out, TT) output tile of a 1-D valid conv."""

    def kernel(x_ref, w_ref, b_ref, o_ref):
        # x_ref: (Cin_pad, TT + K - 1)   (== (Cin_pad, TT) when K == 1)
        # w_ref: (K, Cout, Cin_pad)
        # b_ref: (Cout, 1)
        # o_ref: (Cout, TT)
        acc = jnp.dot(w_ref[0], x_ref[:, 0:TT],
                      preferred_element_type=jnp.float32)
        for k in range(1, K):                      # static unrolled taps
            acc = acc + jnp.dot(w_ref[k], x_ref[:, k:k + TT],
                                preferred_element_type=jnp.float32)
        o_ref[...] = (acc + b_ref[...].astype(jnp.float32)).astype(o_ref.dtype)

    return kernel


@partial(jax.jit, static_argnames=("kernel_size",))
def no_ft_forward(x, weight, bias, kernel_size: int = 1):
    """Conv1d forward matching nn.Conv1d(in_channels, out_dims, kernel_size).

    x:      [B, C_in, T]
    weight: [C_out, C_in, K]
    bias:   [C_out]
    returns [B, C_out, T - K + 1]
    """
    B, Cin, T = x.shape
    Cout, Cin_w, K = weight.shape
    assert Cin_w == Cin and K == kernel_size
    Tout = T - K + 1
    assert Tout >= 1

    LANE, SUB = 128, 8
    # Minimal lane padding of the output time axis, then the largest tile
    # (<= 512, multiple of 128) that divides it evenly.
    Tout_pad = _round_up(Tout, LANE)
    TT = LANE
    for cand in (512, 384, 256):
        if Tout_pad % cand == 0:
            TT = cand
            break
    nT = Tout_pad // TT
    Cin_pad = _round_up(Cin, SUB)

    # Zero-pad channels (contribute nothing) and time (garbage columns beyond
    # Tout are sliced off at the end).
    T_pad = Tout_pad + (K - 1)
    x_p = jnp.pad(x, ((0, 0), (0, Cin_pad - Cin), (0, T_pad - T)))

    # weight -> (K, Cout, Cin_pad), bias -> (Cout, 1)
    w_kco = jnp.pad(jnp.transpose(weight, (2, 0, 1)),
                    ((0, 0), (0, 0), (0, Cin_pad - Cin)))
    b_col = bias.reshape(Cout, 1)

    kernel = _make_conv_kernel(K, TT)

    w_spec = pl.BlockSpec((K, Cout, Cin_pad), lambda b, t: (0, 0, 0))
    b_spec = pl.BlockSpec((Cout, 1), lambda b, t: (0, 0))
    out_spec = pl.BlockSpec((None, Cout, TT), lambda b, t: (b, 0, t))

    if K == 1:
        # Clean blocked tiling of x along time (no halo needed).
        x_in = x_p                                                # (B, Cin_pad, Tout_pad)
        x_spec = pl.BlockSpec((None, Cin_pad, TT), lambda b, t: (b, 0, t))
    else:
        # Overlapping windows (halo = K-1 columns) so in-kernel slices stay
        # static; overlap overhead is (K-1)/TT, negligible vs K-fold im2col.
        TTW = TT + K - 1
        x_in = jnp.stack(
            [x_p[:, :, t * TT: t * TT + TTW] for t in range(nT)], axis=1
        )                                                         # (B, nT, Cin_pad, TTW)
        x_spec = pl.BlockSpec((None, None, Cin_pad, TTW),
                              lambda b, t: (b, t, 0, 0))

    out_pad = pl.pallas_call(
        kernel,
        out_shape=jax.ShapeDtypeStruct((B, Cout, Tout_pad), x.dtype),
        grid_spec=pltpu.PrefetchScalarGridSpec(
            num_scalar_prefetch=0,
            grid=(B, nT),
            in_specs=[x_spec, w_spec, b_spec],
            out_specs=out_spec,
        ),
        compiler_params=pltpu.CompilerParams(
            dimension_semantics=("parallel", "parallel")),
    )(x_in, w_kco, b_col)

    # Output is already NCT; just drop the time padding.
    return out_pad[:, :, :Tout]


if __name__ == "__main__":
    # Matches NoFt(in_chnnels=4, out_dims=8, kernel_size=1).
    B, Cin, T = 2, 4, 16
    Cout = 8

    key = jax.random.PRNGKey(0)
    kx, kw1, kb1, kw3, kb3 = jax.random.split(key, 5)
    x = jax.random.normal(kx, (B, Cin, T), dtype=jnp.float32)

    # ---- kernel_size = 1 (module default) ---------------------------------
    K = 1
    bound = 1.0 / ((Cin * K) ** 0.5)
    w1 = jax.random.uniform(kw1, (Cout, Cin, K), jnp.float32, -bound, bound)
    b1 = jax.random.uniform(kb1, (Cout,), jnp.float32, -bound, bound)

    out1 = jax.block_until_ready(no_ft_forward(x, w1, b1, kernel_size=K))
    ref1 = jnp.einsum("bct,oc->bot", x, w1[:, :, 0]) + b1[None, :, None]
    assert out1.shape == (B, Cout, T - K + 1)
    assert jnp.allclose(out1, ref1, atol=1e-5, rtol=1e-5)

    # ---- kernel_size = 3 (exercise the multi-tap / halo path) -------------
    K = 3
    bound = 1.0 / ((Cin * K) ** 0.5)
    w3 = jax.random.uniform(kw3, (Cout, Cin, K), jnp.float32, -bound, bound)
    b3 = jax.random.uniform(kb3, (Cout,), jnp.float32, -bound, bound)

    out3 = jax.block_until_ready(no_ft_forward(x, w3, b3, kernel_size=K))
    Tout3 = T - K + 1
    ref3 = b3[None, :, None] + sum(
        jnp.einsum("bct,oc->bot", x[:, :, k:k + Tout3], w3[:, :, k])
        for k in range(K))
    assert out3.shape == (B, Cout, Tout3)
    assert jnp.allclose(out3, ref3, atol=1e-4, rtol=1e-4)

    print("KERNEL_OK")
</pallas_src>

<mosaic_0001>
module attributes {stable_mosaic.version = 11 : i64} {
  func.func @kernel(%arg0: i32, %arg1: i32, %arg2: memref<1x8x128xf32, #tpu.memory_space<vmem>>, %arg3: memref<1x8x8xf32, #tpu.memory_space<vmem>>, %arg4: memref<8x1xf32, #tpu.memory_space<vmem>>, %arg5: memref<1x8x128xf32, #tpu.memory_space<vmem>>) attributes {dimension_semantics = [#tpu.dimension_semantics<parallel>, #tpu.dimension_semantics<parallel>], iteration_bounds = array<i64: 2, 1>, scalar_prefetch = 0 : i64, scratch_operands = 0 : i64, tpu.core_type = #tpu.core_type<tc>, window_params = [{transform_indices = @transform_0, window_bounds = array<i64: 1, 8, 128>}, {pipeline_mode = #tpu.pipeline_mode<synchronous>, transform_indices = @transform_1, window_bounds = array<i64: 1, 8, 8>}, {pipeline_mode = #tpu.pipeline_mode<synchronous>, transform_indices = @transform_2, window_bounds = array<i64: 8, 1>}, {transform_indices = @transform_3, window_bounds = array<i64: 1, 8, 128>}]} {
    %c0 = arith.constant 0 : index
    %c0_0 = arith.constant 0 : index
    %c0_1 = arith.constant 0 : index
    %0 = vector.load %arg3[%c0, %c0_0, %c0_1] : memref<1x8x8xf32, #tpu.memory_space<vmem>>, vector<1x8x8xf32>
    %1 = vector.shape_cast %0 : vector<1x8x8xf32> to vector<8x8xf32>
    %c0_2 = arith.constant 0 : index
    %c0_3 = arith.constant 0 : index
    %c0_4 = arith.constant 0 : index
    %2 = vector.load %arg2[%c0_2, %c0_3, %c0_4] : memref<1x8x128xf32, #tpu.memory_space<vmem>>, vector<1x8x128xf32>
    %3 = vector.shape_cast %2 : vector<1x8x128xf32> to vector<8x128xf32>
    %cst = arith.constant dense<0.000000e+00> : vector<8x128xf32>
    %4 = tpu.matmul %1, %3, %cst {dimension_numbers = #tpu.dot_dimension_numbers<[1], [0], [0], [1], [0, 0, 1, 1], [], []>} : vector<8x8xf32>, vector<8x128xf32>, vector<8x128xf32> -> vector<8x128xf32>
    %c0_5 = arith.constant 0 : index
    %c0_6 = arith.constant 0 : index
    %5 = vector.load %arg4[%c0_5, %c0_6] : memref<8x1xf32, #tpu.memory_space<vmem>>, vector<8x1xf32>
    %6 = vector.broadcast %5 : vector<8x1xf32> to vector<8x128xf32>
    %7 = arith.addf %4, %6 : vector<8x128xf32>
    %c0_7 = arith.constant 0 : index
    %c0_8 = arith.constant 0 : index
    %c0_9 = arith.constant 0 : index
    %8 = vector.load %arg5[%c0_7, %c0_8, %c0_9] : memref<1x8x128xf32, #tpu.memory_space<vmem>>, vector<1x8x128xf32>
    %9 = vector.shape_cast %8 : vector<1x8x128xf32> to vector<8x128xf32>
    %10 = vector.shape_cast %7 : vector<8x128xf32> to vector<1x8x128xf32>
    tpu.vector_store %arg5[%c0_7, %c0_8, %c0_9], %10 {strides = array<i32>} : memref<1x8x128xf32, #tpu.memory_space<vmem>>, vector<1x8x128xf32>,
    return
  }
  func.func @transform_0(%arg0: i32, %arg1: i32) -> (i32, i32, i32) {
    %c0_i32 = arith.constant 0 : i32
    %c0_i32_0 = arith.constant 0 : i32
    return %arg0, %c0_i32, %arg1 : i32, i32, i32
  }
  func.func @transform_1(%arg0: i32, %arg1: i32) -> (i32, i32, i32) {
    %c0_i32 = arith.constant 0 : i32
    %c0_i32_0 = arith.constant 0 : i32
    %c0_i32_1 = arith.constant 0 : i32
    %c0_i32_2 = arith.constant 0 : i32
    return %c0_i32, %c0_i32_0, %c0_i32_1 : i32, i32, i32
  }
  func.func @transform_2(%arg0: i32, %arg1: i32) -> (i32, i32) {
    %c0_i32 = arith.constant 0 : i32
    %c0_i32_0 = arith.constant 0 : i32
    %c0_i32_1 = arith.constant 0 : i32
    return %c0_i32, %c0_i32_0 : i32, i32
  }
  func.func @transform_3(%arg0: i32, %arg1: i32) -> (i32, i32, i32) {
    %c0_i32 = arith.constant 0 : i32
    %c0_i32_0 = arith.constant 0 : i32
    return %arg0, %c0_i32, %arg1 : i32, i32, i32
  }
}

</mosaic_0001>

<bundles_post_ra>
// kernel: no_ft_forward.1
= control target key start
LH: loop header
LB: loop body
LE: loop exit
PB: predicated region body
PF: predicated region fallthrough
CT: control target
= control target key end

     0   :  { %8 = vsyncpa [#allocation3], 0  ;;  %s651_s0 = inlined_call_operand.vmem [shape: f32[2,8,128], index: 0, kind: input, shape index: {}]   ;;  %s652_s1 = inlined_call_operand.vmem [shape: f32[1,8,8], index: 1, kind: input, shape index: {}]   ;;  %s653_s2 = inlined_call_operand.vmem [shape: f32[8,1], index: 2, kind: input, shape index: {}]   ;;  %s654_s3 = inlined_call_operand.hbm [shape: f32[2,8,128], index: 3, kind: output, shape index: {}]  }
   0x1   :  { %10 = vsyncpa [#allocation3 + $0x1], 0  ;;  %s540_s12 = smov 0   ;;  %s542_s13 = smov 0  }
   0x2   :  { %s544_s14 = smov 0   ;;  %s546_s15 = smov 0  }
   0x3   :  { %s548_s16 = smov 0   ;;  %s550_s17 = smov 0  }
   0x4 LB: > { %s360_s18 = sadd.s32 4294967295, %s514_s17   ;;  %s361_s19 = sadd.s32 4294967294, %s514_s17   ;;  %s514_s17 = sphi %s550_s17, %s16_s17   ;;  %s510_s16 = sphi %s548_s16, %s661_s16   ;;  %s506_s15 = sphi %s546_s15, %s660_s15   ;;  %s502_s14 = sphi %s544_s14, %s659_s14   ;;  %s498_s13 = sphi %s542_s13, %s658_s13   ;;  %s494_s12 = sphi %s540_s12, %s657_s12  }
   0x5   : > { %s28_s20 = sadd.s32 1, %s510_s16  ;;  %s107_s21 = sadd.s32 1, %s502_s14 }
   0x6   : > { %p30_p0 = scmp.ge.s32.totalorder %s28_s20, 2  ;;  %p117_p1 = scmp.ne.s32.totalorder %s502_s14, %s498_s13 }
   0x7   : > { %p118_p2 = scmp.eq.s32.totalorder %s360_s18, 1  ;;  %p123_p3 = scmp.ne.s32.totalorder %s498_s13, %s494_s12 }
   0x8   : > { %s663_s20 = smov (%p30_p0, %s28_s20), 0  ;;  %p124_p5 = scmp.eq.s32.totalorder %s361_s19, 1 }
   0x9   : > { %p580_p4 = por %p118_p2, %p117_p1  ;;  %s102_s23 = ssub.s32 %s510_s16, %s663_s20 }
   0xa   : > { %p364_p6 = scmp.ge.s32.totalorder %s514_s17, 1  ;;  %p105_p7 = scmp.eq.s32.totalorder %s102_s23, 0 }
   0xb   : > { %p587_p8 = por %p124_p5, %p123_p3  ;;  %p158_p9 = scmp.lt.s32.totalorder %s514_s17, 3 }
   0xc   : > { %s593_s25 = scalar_select %p105_p7, %s502_s14, %s107_s21  }
   0xd   : > { %p159_p10 = pnand %p364_p6, %p158_p9 }
   0xe   : > { %p184_p11 = scmp.lt.s32.totalorder (!%p159_p10), %s506_s15, 1  ;;  %s181_s8 = sand.u32 (!%p159_p10), 1, %s498_s13  }
   0xf   : > { %162 = sbr.rel (%p159_p10) target bundleno = 234 (0xea), region = 32  ;;  %s365_s9 = sshll.u32 (!%p159_p10), %s181_s8, 3 }
  0x10   : > { %s369_s10 = sshll.u32 (!%p159_p10), %s506_s15, 7  ;;  %s183_s11 = scalar_lea.vmem (!%p159_p10), [#allocation2], %s365_s9 }
  0x11   : > { %s289_s18 = sshll.u32 (!%p159_p10), %s183_s11, 4  ;;  %s611_s23 = scalar_lea.hbm (!%p159_p10), %s654_s3, %s369_s10  ;;  %s290_s18 = int_to_ptr.vmem [resolvable:$true] %s289_s18 }
  0x12   : > { %s275_s26 = scalar_lea.sflag (!%p159_p10), [#allocation3], %s181_s8  ;;  %s438_s27 = scalar_lea.vmem (!%p159_p10), %s290_s18, 128 }
  0x13   : > { %p439_p12 = scmp.ne.s32.totalorder (!%p159_p10), %s290_s18, %s438_s27 }
  0x14   : > { %v516_v0 = vmov 0.0   ;;  %vm517_vm0 = vmmov 0   ;;  %v193_v1 = vld [vmem:[%s653_s2] sm:$0xff]  ;;  %s185_s28 = scalar_select %p184_p11, %s506_s15, 1  ;;  %v518_v2 = vmov 0   ;;  %vm199_vm1 = vcmask 64512  }
  0x15   : > { %374 = vmatprep.subr.mxu0 %v516_v0  ;;  %376 = vmatprep.mubr.msk.f32.mxu0 %vm517_vm0, %v516_v0  ;;  %v191_v3 = vld [vmem:[%s652_s1] sm:$0xff]  ;;  %p440_p13 = pnand %p439_p12, %p580_p4 }
  0x16   : > { %437 = vset.pattern.permute.xlu0 %v518_v2  ;;  %s366_s29 = sshll.u32 %s185_s28, 3  ;;  %s519_s28 = smov [#allocation2]  }
  0x17   : > { %196 = vperm.xlu0 %437, %v193_v1   ;;  %s190_s5 = scalar_lea.vmem %s651_s0, %s366_s29  ;;  %p441_p0 = pneg %p440_p13 }
  0x18   : > { %v192_v4 = vld [vmem:[%s190_s5] sm:$0xff]  ;;  %s442_s15 = sshll.u32 %s519_s28, 4  ;;  %s443_s15 = int_to_ptr.vmem [resolvable:$false] %s442_s15 }
  0x19   : > { %375 = vmatpush3.msra.mxu0 %v192_v4  ;;  %s444_s29 = scalar_lea.vmem %s443_s15, 256  ;;  %p445_p1 = scmp.lt.s32.totalorder %s290_s18, %s443_s15 }
  0x1a   : > { %377 = vmatmul.mubr.msk.f32.vlgmr.msra.gmra.mxu0 %vm199_vm1, %v191_v3  ;;  %p446_p2 = scmp.lt.s32.totalorder %s444_s29, %s438_s27 }
  0x1c   : > { %p447_p3 = por %p446_p2, %p445_p1 }
  0x1e   : > { %p448_p5 = pnand %p447_p3, %p441_p0 }
  0x92   : > { %v197_v5 = vpop.permute.xlu0 %196 }
  0xda   : > { %v269_v6 = vpop.f32.mrf.mxu0 }
  0xdb   : > { %v270_v7 = vadd.f32 %v269_v6, %v197_v5 }
  0xdc   : > { %v378_v8 = vpop.f32.mrf.mxu0 }
  0xdd   : > { %273 = vst [vmem:[%s183_s11] sm:$0xff] %v270_v7 }
  0xde   : > { %451 = shalt.err (!%p448_p5)
}
  0xdf   : > { %s452_s30 = scalar_lea.hbm %s611_s23, 128  ;;  %s456_s6 = scalar_lea.hbm %s654_s3, 256 }
  0xe0   : > { %p453_p6 = scmp.ne.s32.totalorder %s611_s23, %s452_s30  ;;  %p457_p10 = scmp.lt.s32.totalorder %s611_s23, %s654_s3 }
  0xe1   : > { %p458_p11 = scmp.lt.s32.totalorder %s456_s6, %s452_s30 }
  0xe2   : > { %p454_p7 = pnand %p453_p6, %p580_p4 }
  0xe3   : > { %p459_p12 = por %p458_p11, %p457_p10 }
  0xe4   : > { %p455_p9 = pneg %p454_p7 }
  0xe6   : > { %p460_p13 = pnand %p459_p12, %p455_p9 }
  0xe8   : > { %463 = shalt.err (!%p460_p13)
}
  0xe9   : > { %379 = dma.vmem_to_hbm [thread:$0]  (%p580_p4), %s290_s18, 128, %s611_s23, %s275_s26  }
  0xea PF: > { %p385_p0 = scmp.ge.s32.totalorder %s514_s17, 2  ;;  %s301_s9 = sand.u32 1, %s494_s12  }
  0xeb   : > { %s302_s10 = scalar_lea.sflag [#allocation3], %s301_s9 }
  0xec   : > { %p382_p1 = pnand %p385_p0, %p587_p8 }
  0xee   : > { %p383_p2 = pneg %p382_p1 }
  0xf0   : > { %489 = dma.done.wait (%p383_p2), %s302_s10, 128  }
  0xf1   : > { %491 = vsyncadd (%p383_p2), %s302_s10, 4294967168  ;;  %s16_s17 = sadd.s32 1, %s514_s17   ;;  %s657_s12 = smov %s498_s13 }
  0xf2   : > { %p13_p3 = scmp.ge.s32.totalorder %s16_s17, 4   ;;  %s658_s13 = smov %s502_s14 }
  0xf3   : > { %s659_s14 = smov %s593_s25  ;;  %s660_s15 = smov %s510_s16 }
  0xf4   : > { %s661_s16 = smov %s663_s20  ;;  %15 = sbr.rel (!%p13_p3) target bundleno = 4 (0x4), region = 67 }
  0xf9   :  { %307 = vsyncpa [#allocation3], 1 }
  0xfa   :  { %309 = vsyncpa [#allocation3 + $0x1], 1 }

</bundles_post_ra>
